<compile_context>
chip_gen: v6e
topology: v6e:2x2x1
jax: 0.10.0
libtpu: 0.0.40
codegen_flags: <defaults>
</compile_context>

<pallas_src>
import functools
import math

import jax
import jax.numpy as jnp
from jax.experimental import pallas as pl
from jax.experimental.pallas import tpu as pltpu

_INV_SQRT2 = 1.0 / math.sqrt(2.0)
_LANE = 128
_SUBLANE = 8
_MIB = 1024 * 1024


def _round_up(x, m):
    return (x + m - 1) // m * m


def _cdiv(a, b):
    return (a + b - 1) // b


# --------------------------------------------------------------------------- #
# Kernel
# --------------------------------------------------------------------------- #
def _ff_kernel(x_ref, w1_ref, b1_ref, w2_ref, b2_ref, o_ref, acc_ref, *,
               approximate_gelu):
    """Grid = (row_tiles, hidden_chunks). For one (tm, dim_p) row tile:
         acc += GELU(x @ W1[:, k-chunk] + b1[k-chunk]) @ W2[k-chunk, :]
       finalized with + b2 on the last hidden chunk."""
    k = pl.program_id(1)

    @pl.when(k == 0)
    def _init():
        acc_ref[...] = jnp.zeros_like(acc_ref)

    # f32 weights -> multi-pass exact MXU matmul; bf16 weights -> native bf16 rate.
    prec = (jax.lax.Precision.HIGHEST if w1_ref.dtype == jnp.float32
            else jax.lax.Precision.DEFAULT)

    # First linear on the MXU with f32 accumulation; x cast to the weight dtype
    # on the VPU (free under MXU work) so bf16 weights see bf16 operands.
    x = x_ref[...].astype(w1_ref.dtype)
    h = jnp.dot(x, w1_ref[...], preferred_element_type=jnp.float32, precision=prec)
    h = h + b1_ref[...]                                   # bias add in f32

    if approximate_gelu:
        # tanh GELU routes the transcendental to the (otherwise idle) EUP slot.
        h = jax.nn.gelu(h, approximate=True)
    else:
        # Exact erf GELU: matches torch.nn.GELU() default numerics.
        h = 0.5 * h * (1.0 + jax.lax.erf(h * _INV_SQRT2))

    # Second linear, accumulated across hidden chunks in f32.
    acc_ref[...] += jnp.dot(h.astype(w2_ref.dtype), w2_ref[...],
                            preferred_element_type=jnp.float32, precision=prec)

    @pl.when(k == pl.num_programs(1) - 1)
    def _finalize():
        o_ref[...] = (acc_ref[...] + b2_ref[...]).astype(o_ref.dtype)


# --------------------------------------------------------------------------- #
# pallas_call wrapper (jitted; all tiling config is static)
# --------------------------------------------------------------------------- #
@functools.partial(
    jax.jit,
    static_argnames=("tm", "hk", "vmem_limit_bytes", "approximate_gelu"))
def _ff_call(x, w1_p, b1_p, w2_p, b2_p, *, tm, hk, vmem_limit_bytes,
             approximate_gelu):
    dim = x.shape[-1]
    dim_p, hid_p = w1_p.shape
    lead_shape = x.shape[:-1]
    N = int(math.prod(lead_shape))

    x2d = x.reshape(N, dim)
    if dim_p != dim:
        # Rare path (dim % 128 != 0): zero feature-padding is exact.
        x2d = jnp.pad(x2d, ((0, 0), (0, dim_p - dim)))

    row_tiles = _cdiv(N, tm)           # ragged last row block is masked by Pallas
    k_chunks = hid_p // hk             # hk always divides hid_p (see _pick_tiles)
    grid = (row_tiles, k_chunks)

    x_bytes = jnp.dtype(x.dtype).itemsize
    w_bytes = jnp.dtype(w1_p.dtype).itemsize
    cost = pl.CostEstimate(
        flops=4 * N * dim_p * hid_p,                         # two matmuls
        transcendentals=N * hid_p,                           # one erf/tanh per h elem
        bytes_accessed=int(2 * N * dim_p * x_bytes           # x in + out
                           + row_tiles * 2 * dim_p * hid_p * w_bytes
                           + (hid_p + dim_p) * 4),
    )

    out2d = pl.pallas_call(
        functools.partial(_ff_kernel, approximate_gelu=approximate_gelu),
        out_shape=jax.ShapeDtypeStruct((N, dim_p), x.dtype),
        grid_spec=pltpu.PrefetchScalarGridSpec(
            num_scalar_prefetch=0,
            grid=grid,
            in_specs=[
                pl.BlockSpec((tm, dim_p), lambda i, k: (i, 0)),   # x row tile
                pl.BlockSpec((dim_p, hk), lambda i, k: (0, k)),   # W1 panel
                pl.BlockSpec((1, hk),     lambda i, k: (0, k)),   # b1 chunk
                pl.BlockSpec((hk, dim_p), lambda i, k: (k, 0)),   # W2 panel
                pl.BlockSpec((1, dim_p),  lambda i, k: (0, 0)),   # b2 (resident)
            ],
            out_specs=pl.BlockSpec((tm, dim_p), lambda i, k: (i, 0)),
            scratch_shapes=[pltpu.VMEM((tm, dim_p), jnp.float32)],  # f32 accumulator
        ),
        compiler_params=pltpu.CompilerParams(
            dimension_semantics=("parallel", "arbitrary"),
            vmem_limit_bytes=int(vmem_limit_bytes),
        ),
        cost_estimate=cost,
    )(x2d, w1_p, b1_p, w2_p, b2_p)

    if dim_p != dim:
        out2d = out2d[:, :dim]
    return out2d.reshape(lead_shape + (dim,))


# --------------------------------------------------------------------------- #
# Per-chip defaults & tile selection
# --------------------------------------------------------------------------- #
@functools.lru_cache(maxsize=1)
def _chip_defaults():
    """Returns (physical VMEM bytes, default row tile) for the local TPU."""
    kind = ""
    try:
        kind = jax.devices()[0].device_kind.lower()
    except Exception:
        pass
    vmem_cap = None
    try:
        vmem_cap = int(pltpu.get_tpu_info().vmem_capacity_bytes)
    except Exception:
        vmem_cap = None
    if not vmem_cap or vmem_cap <= 0:
        # v5e/v6e have 128 MiB VMEM; v7x has 64 MiB/TC. Be conservative if unknown.
        vmem_cap = 128 * _MIB if ("v5" in kind or "v6" in kind) else 64 * _MIB
    # Streamed-weight breakeven (MXU peak / HBM BW): ~240 rows on v5e, ~700 on v6e/v7x.
    is_v5e = ("v5e" in kind) or ("v5 lite" in kind) or ("v5lite" in kind)
    default_tm = 256 if is_v5e else 768
    return vmem_cap, default_tm


def _largest_aligned_divisor(hid_p, max_chunk):
    """Largest multiple of 128 that divides hid_p and is <= max_chunk."""
    m = hid_p // _LANE
    top = max(1, min(m, max_chunk // _LANE))
    for d in range(top, 0, -1):
        if m % d == 0:
            return d * _LANE
    return _LANE


def _pick_tiles(N, dim_p, hid_p, x_bytes, w_bytes, out_bytes,
                tile_rows, hidden_chunk, vmem_budget):
    tm = max(_SUBLANE, _round_up(min(tile_rows, _round_up(N, _SUBLANE)), _SUBLANE))
    # Megacore (v7x): keep >= 2 row tiles when N allows so the "parallel" axis
    # can be split across both TensorCores.
    if _cdiv(N, tm) < 2 and N > _SUBLANE:
        tm = max(_SUBLANE, _round_up(_cdiv(N, 2), _SUBLANE))

    hk_cap = hidden_chunk if hidden_chunk is not None else 2048
    hk = _largest_aligned_divisor(hid_p, max(_LANE, hk_cap))

    def vmem_est(tm_, hk_):
        return (2 * tm_ * dim_p * x_bytes          # x tile (double-buffered)
                + 2 * dim_p * hk_ * w_bytes        # W1 panel (double-buffered)
                + 2 * hk_ * dim_p * w_bytes        # W2 panel (double-buffered)
                + 2 * (hk_ + dim_p) * 4            # biases (f32)
                + 2 * tm_ * dim_p * out_bytes      # output tile
                + tm_ * dim_p * 4                  # f32 accumulator scratch
                + tm_ * hk_ * (4 + w_bytes))       # h intermediate (f32 + cast copy)

    budget = int(0.8 * vmem_budget)                # headroom for Mosaic scratch
    while vmem_est(tm, hk) > budget and hk > _LANE:
        hk = _largest_aligned_divisor(hid_p, max(_LANE, hk // 2))
    while vmem_est(tm, hk) > budget and tm > 64:
        tm = max(64, _round_up(tm // 2, _SUBLANE))
    return tm, hk


# --------------------------------------------------------------------------- #
# Public API
# --------------------------------------------------------------------------- #
def prepare_ffn_params(w1, b1, w2, b2, *, use_bf16=True):
    """Pad weights to lane multiples and cast ONCE, outside the hot path.

    Expects W1:(dim, hidden), W2:(hidden, dim) (transposed vs torch Linear.weight).
    Biases are kept in f32 (bias add + GELU run in f32 regardless of matmul dtype).
    Zero padding is exact: padded bias 0 -> GELU(0)=0 -> multiplied by zero W2 rows.
    """
    dim, hidden = w1.shape
    assert w2.shape == (hidden, dim) and b1.shape == (hidden,) and b2.shape == (dim,)
    dim_p = _round_up(dim, _LANE)
    hid_p = _round_up(hidden, _LANE)
    wdt = jnp.bfloat16 if use_bf16 else jnp.float32
    w1_p = jnp.pad(w1.astype(wdt), ((0, dim_p - dim), (0, hid_p - hidden)))
    w2_p = jnp.pad(w2.astype(wdt), ((0, hid_p - hidden), (0, dim_p - dim)))
    b1_p = jnp.pad(b1.astype(jnp.float32), (0, hid_p - hidden)).reshape(1, hid_p)
    b2_p = jnp.pad(b2.astype(jnp.float32), (0, dim_p - dim)).reshape(1, dim_p)
    return {"w1": w1_p, "b1": b1_p, "w2": w2_p, "b2": b2_p,
            "dim": dim, "hidden": hidden}


def feed_forward_prepared(x, params, *, tile_rows=None, hidden_chunk=None,
                          approximate_gelu=False):
    """x: (..., dim) -> (..., dim) in x.dtype, using pre-padded/cast params."""
    dim = params["dim"]
    assert x.shape[-1] == dim
    w1_p, b1_p, w2_p, b2_p = params["w1"], params["b1"], params["w2"], params["b2"]
    dim_p, hid_p = w1_p.shape
    N = int(math.prod(x.shape[:-1]))

    vmem_cap, default_tm = _chip_defaults()
    vmem_limit = max(32 * _MIB, (vmem_cap * 3) // 4)   # ~96 MiB v5e/v6e, ~48 MiB v7x
    if tile_rows is None:
        tile_rows = default_tm

    tm, hk = _pick_tiles(
        N, dim_p, hid_p,
        x_bytes=jnp.dtype(x.dtype).itemsize,
        w_bytes=jnp.dtype(w1_p.dtype).itemsize,
        out_bytes=jnp.dtype(x.dtype).itemsize,
        tile_rows=tile_rows, hidden_chunk=hidden_chunk, vmem_budget=vmem_limit)

    return _ff_call(x, w1_p, b1_p, w2_p, b2_p, tm=tm, hk=hk,
                    vmem_limit_bytes=int(vmem_limit),
                    approximate_gelu=bool(approximate_gelu))


def feed_forward(x, w1, b1, w2, b2, *, use_bf16=True, tile_rows=None,
                 hidden_chunk=None, approximate_gelu=False):
    """One-shot convenience wrapper. For repeated calls, call prepare_ffn_params()
    once and reuse feed_forward_prepared() (avoids re-padding/casting weights)."""
    params = prepare_ffn_params(w1, b1, w2, b2, use_bf16=use_bf16)
    return feed_forward_prepared(x, params, tile_rows=tile_rows,
                                 hidden_chunk=hidden_chunk,
                                 approximate_gelu=approximate_gelu)


# --------------------------------------------------------------------------- #
# Demo / correctness check
# --------------------------------------------------------------------------- #
def _init_linear(key, fan_in, fan_out):
    """Deterministic PyTorch-style Linear init; W stored as (fan_in, fan_out)."""
    kw, kb = jax.random.split(key)
    bound = 1.0 / math.sqrt(fan_in)
    w = jax.random.uniform(kw, (fan_in, fan_out), jnp.float32, -bound, bound)
    b = jax.random.uniform(kb, (fan_out,), jnp.float32, -bound, bound)
    return w, b


def _reference(x, w1, b1, w2, b2):
    h = x @ w1 + b1
    h = 0.5 * h * (1.0 + jax.lax.erf(h * _INV_SQRT2))
    return h @ w2 + b2


if __name__ == "__main__":
    # Small shapes consistent with the module: batch=2, seq=8, dim=32, hidden=64.
    B, S, DIM, HIDDEN = 2, 8, 32, 64

    key = jax.random.PRNGKey(0)
    kx, k1, k2 = jax.random.split(key, 3)

    x = jax.random.normal(kx, (B, S, DIM), jnp.float32)
    w1, b1 = _init_linear(k1, DIM, HIDDEN)
    w2, b2 = _init_linear(k2, HIDDEN, DIM)

    ref = _reference(x, w1, b1, w2, b2)

    # Exact f32 path: tight match against the erf-GELU reference.
    p_f32 = prepare_ffn_params(w1, b1, w2, b2, use_bf16=False)
    out_f32 = jax.block_until_ready(feed_forward_prepared(x, p_f32))
    assert out_f32.shape == (B, S, DIM)
    assert jnp.allclose(out_f32, ref, atol=1e-4, rtol=1e-4)

    # Default fast path: bf16 MXU operands, f32 accumulation (looser tolerance).
    p_bf16 = prepare_ffn_params(w1, b1, w2, b2, use_bf16=True)
    out_bf16 = jax.block_until_ready(feed_forward_prepared(x, p_bf16))
    assert out_bf16.shape == (B, S, DIM)
    assert jnp.allclose(out_bf16, ref, atol=5e-2, rtol=5e-2)

    print("KERNEL_OK")
</pallas_src>

<mosaic_0001>
module attributes {stable_mosaic.version = 11 : i64} {
  func.func @_ff_kernel(%arg0: i32, %arg1: i32, %arg2: memref<8x128xf32, #tpu.memory_space<vmem>>, %arg3: memref<128x128xf32, #tpu.memory_space<vmem>>, %arg4: memref<1x128xf32, #tpu.memory_space<vmem>>, %arg5: memref<128x128xf32, #tpu.memory_space<vmem>>, %arg6: memref<1x128xf32, #tpu.memory_space<vmem>>, %arg7: memref<8x128xf32, #tpu.memory_space<vmem>>, %arg8: memref<8x128xf32, #tpu.memory_space<vmem>>) attributes {dimension_semantics = [#tpu.dimension_semantics<parallel>, #tpu.dimension_semantics<arbitrary>], iteration_bounds = array<i64: 2, 1>, scalar_prefetch = 0 : i64, scratch_operands = 1 : i64, tpu.core_type = #tpu.core_type<tc>, window_params = [{transform_indices = @transform_0, window_bounds = array<i64: 8, 128>}, {transform_indices = @transform_1, window_bounds = array<i64: 128, 128>}, {transform_indices = @transform_2, window_bounds = array<i64: 1, 128>}, {transform_indices = @transform_3, window_bounds = array<i64: 128, 128>}, {pipeline_mode = #tpu.pipeline_mode<synchronous>, transform_indices = @transform_4, window_bounds = array<i64: 1, 128>}, {transform_indices = @transform_5, window_bounds = array<i64: 8, 128>}]} {
    %c0_i32 = arith.constant 0 : i32
    %0 = arith.cmpi eq, %arg1, %c0_i32 : i32
    %1 = arith.extui %0 : i1 to i32
    %c0_i32_0 = arith.constant 0 : i32
    %2 = arith.cmpi ne, %1, %c0_i32_0 : i32
    scf.if %2 {
      %cst_18 = arith.constant 0.000000e+00 : f32
      %25 = vector.broadcast %cst_18 : f32 to vector<8x128xf32>
      %c0_19 = arith.constant 0 : index
      %c0_20 = arith.constant 0 : index
      %26 = vector.load %arg8[%c0_19, %c0_20] : memref<8x128xf32, #tpu.memory_space<vmem>>, vector<8x128xf32>
      tpu.vector_store %arg8[%c0_19, %c0_20], %25 {strides = array<i32>} : memref<8x128xf32, #tpu.memory_space<vmem>>, vector<8x128xf32>,
    } else {
    }
    %c0 = arith.constant 0 : index
    %c0_1 = arith.constant 0 : index
    %3 = vector.load %arg2[%c0, %c0_1] : memref<8x128xf32, #tpu.memory_space<vmem>>, vector<8x128xf32>
    %c0_2 = arith.constant 0 : index
    %c0_3 = arith.constant 0 : index
    %4 = vector.load %arg3[%c0_2, %c0_3] : memref<128x128xf32, #tpu.memory_space<vmem>>, vector<128x128xf32>
    %cst = arith.constant dense<0.000000e+00> : vector<8x128xf32>
    %5 = tpu.matmul %3, %4, %cst {dimension_numbers = #tpu.dot_dimension_numbers<[1], [0], [0], [1], [0, 0, 1, 1], [], []>, precision = #tpu.contract_precision<fp32>} : vector<8x128xf32>, vector<128x128xf32>, vector<8x128xf32> -> vector<8x128xf32>
    %c0_4 = arith.constant 0 : index
    %c0_5 = arith.constant 0 : index
    %6 = vector.load %arg4[%c0_4, %c0_5] : memref<1x128xf32, #tpu.memory_space<vmem>>, vector<1x128xf32>
    %7 = vector.broadcast %6 : vector<1x128xf32> to vector<8x128xf32>
    %8 = arith.addf %5, %7 : vector<8x128xf32>
    %cst_6 = arith.constant 5.000000e-01 : f32
    %9 = vector.broadcast %cst_6 : f32 to vector<8x128xf32>
    %10 = arith.mulf %9, %8 : vector<8x128xf32>
    %cst_7 = arith.constant 0.707106769 : f32
    %11 = vector.broadcast %cst_7 : f32 to vector<8x128xf32>
    %12 = arith.mulf %8, %11 : vector<8x128xf32>
    %13 = math.erf %12 : vector<8x128xf32>
    %cst_8 = arith.constant 1.000000e+00 : f32
    %14 = vector.broadcast %cst_8 : f32 to vector<8x128xf32>
    %15 = arith.addf %14, %13 : vector<8x128xf32>
    %16 = arith.mulf %10, %15 : vector<8x128xf32>
    %c0_9 = arith.constant 0 : index
    %c0_10 = arith.constant 0 : index
    %17 = vector.load %arg8[%c0_9, %c0_10] : memref<8x128xf32, #tpu.memory_space<vmem>>, vector<8x128xf32>
    %c0_11 = arith.constant 0 : index
    %c0_12 = arith.constant 0 : index
    %18 = vector.load %arg5[%c0_11, %c0_12] : memref<128x128xf32, #tpu.memory_space<vmem>>, vector<128x128xf32>
    %cst_13 = arith.constant dense<0.000000e+00> : vector<8x128xf32>
    %19 = tpu.matmul %16, %18, %cst_13 {dimension_numbers = #tpu.dot_dimension_numbers<[1], [0], [0], [1], [0, 0, 1, 1], [], []>, precision = #tpu.contract_precision<fp32>} : vector<8x128xf32>, vector<128x128xf32>, vector<8x128xf32> -> vector<8x128xf32>
    %20 = arith.addf %17, %19 : vector<8x128xf32>
    %c0_14 = arith.constant 0 : index
    %c0_15 = arith.constant 0 : index
    %21 = vector.load %arg8[%c0_14, %c0_15] : memref<8x128xf32, #tpu.memory_space<vmem>>, vector<8x128xf32>
    tpu.vector_store %arg8[%c0_14, %c0_15], %20 {strides = array<i32>} : memref<8x128xf32, #tpu.memory_space<vmem>>, vector<8x128xf32>,
    %c0_i32_16 = arith.constant 0 : i32
    %22 = arith.cmpi eq, %arg1, %c0_i32_16 : i32
    %23 = arith.extui %22 : i1 to i32
    %c0_i32_17 = arith.constant 0 : i32
    %24 = arith.cmpi ne, %23, %c0_i32_17 : i32
    scf.if %24 {
      %c0_18 = arith.constant 0 : index
      %c0_19 = arith.constant 0 : index
      %25 = vector.load %arg8[%c0_18, %c0_19] : memref<8x128xf32, #tpu.memory_space<vmem>>, vector<8x128xf32>
      %c0_20 = arith.constant 0 : index
      %c0_21 = arith.constant 0 : index
      %26 = vector.load %arg6[%c0_20, %c0_21] : memref<1x128xf32, #tpu.memory_space<vmem>>, vector<1x128xf32>
      %27 = vector.broadcast %26 : vector<1x128xf32> to vector<8x128xf32>
      %28 = arith.addf %25, %27 : vector<8x128xf32>
      %c0_22 = arith.constant 0 : index
      %c0_23 = arith.constant 0 : index
      %29 = vector.load %arg7[%c0_22, %c0_23] : memref<8x128xf32, #tpu.memory_space<vmem>>, vector<8x128xf32>
      tpu.vector_store %arg7[%c0_22, %c0_23], %28 {strides = array<i32>} : memref<8x128xf32, #tpu.memory_space<vmem>>, vector<8x128xf32>,
    } else {
    }
    return
  }
  func.func @transform_0(%arg0: i32, %arg1: i32) -> (i32, i32) {
    %c0_i32 = arith.constant 0 : i32
    %c0_i32_0 = arith.constant 0 : i32
    return %arg0, %c0_i32 : i32, i32
  }
  func.func @transform_1(%arg0: i32, %arg1: i32) -> (i32, i32) {
    %c0_i32 = arith.constant 0 : i32
    %c0_i32_0 = arith.constant 0 : i32
    return %c0_i32, %arg1 : i32, i32
  }
  func.func @transform_2(%arg0: i32, %arg1: i32) -> (i32, i32) {
    %c0_i32 = arith.constant 0 : i32
    %c0_i32_0 = arith.constant 0 : i32
    return %c0_i32, %arg1 : i32, i32
  }
  func.func @transform_3(%arg0: i32, %arg1: i32) -> (i32, i32) {
    %c0_i32 = arith.constant 0 : i32
    %c0_i32_0 = arith.constant 0 : i32
    return %arg1, %c0_i32 : i32, i32
  }
  func.func @transform_4(%arg0: i32, %arg1: i32) -> (i32, i32) {
    %c0_i32 = arith.constant 0 : i32
    %c0_i32_0 = arith.constant 0 : i32
    %c0_i32_1 = arith.constant 0 : i32
    return %c0_i32, %c0_i32_0 : i32, i32
  }
  func.func @transform_5(%arg0: i32, %arg1: i32) -> (i32, i32) {
    %c0_i32 = arith.constant 0 : i32
    %c0_i32_0 = arith.constant 0 : i32
    return %arg0, %c0_i32 : i32, i32
  }
}

</mosaic_0001>

<bundles_post_ra>
// kernel: _ff_call.1
= control target key start
LH: loop header
LB: loop body
LE: loop exit
PB: predicated region body
PF: predicated region fallthrough
CT: control target
= control target key end

     0   :  { %10 = vsyncpa [#allocation4], 0  ;;  %s3370_s0 = inlined_call_operand.vmem [shape: f32[16,128], index: 0, kind: input, shape index: {}]   ;;  %s3371_s1 = inlined_call_operand.hbm [shape: f32[128,128], index: 1, kind: input, shape index: {}]   ;;  %s3372_s2 = inlined_call_operand.vmem [shape: f32[1,128], index: 2, kind: input, shape index: {}]   ;;  %s3373_s3 = inlined_call_operand.hbm [shape: f32[128,128], index: 3, kind: input, shape index: {}]   ;;  %s3374_s4 = inlined_call_operand.vmem [shape: f32[1,128], index: 4, kind: input, shape index: {}]   ;;  %s3375_s5 = inlined_call_operand.vmem [shape: f32[16,128], index: 5, kind: output, shape index: {}]  }
   0x1   :  { %11 = vsyncpa [#allocation6], 0  ;;  %s2551_s18 = smov 0   ;;  %s2553_s19 = smov 0  }
   0x2   :  { %s2555_s20 = smov 0  }
   0x3 LB: > { %s1740_s21 = sadd.s32 4294967295, %s2513_s20   ;;  %s29_s22 = sadd.s32 1, %s2509_s19  ;;  %s2513_s20 = sphi %s2555_s20, %s17_s20   ;;  %s2509_s19 = sphi %s2553_s19, %s3394_s19   ;;  %s2505_s18 = sphi %s2551_s18, %s3393_s18  }
   0x4   : > { %p31_p0 = scmp.ge.s32.totalorder %s29_s22, 2  ;;  %p1742_p1 = scmp.ge.s32.totalorder %s2513_s20, 1 }
   0x5   : > { %p185_p2 = scmp.lt.s32.totalorder %s2513_s20, 3  ;;  %p2576_p4 = scmp.eq.s32.totalorder %s1740_s21, 0 }
   0x6   : > { %s3396_s22 = smov (%p31_p0, %s29_s22), 0  ;;  %s2515_s25 = smov [#allocation3]  }
   0x7   : > { %p2572_p3 = pnand %p1742_p1, %p185_p2  ;;  %s199_s26 = sshll.u32 %s2515_s25, 4  ;;  %s200_s26 = int_to_ptr.vmem [resolvable:$true] %s199_s26 }
   0x8   : > { %s2516_s28 = smov [#allocation5]   ;;  %s2442_s30 = scalar_lea.vmem %s200_s26, 2048 }
   0x9   : > { %p2388_p5 = pneg %p2572_p3  ;;  %s221_s29 = sshll.u32 %s2516_s28, 4  ;;  %s222_s29 = int_to_ptr.vmem [resolvable:$true] %s221_s29 }
   0xa   : > { %p2443_p8 = scmp.ne.s32.totalorder %s200_s26, %s2442_s30  ;;  %p2450_p11 = scmp.lt.s32.totalorder %s200_s26, %s200_s26 }
   0xb   : > { %p2584_p6 = pnand %p2576_p4, %p2388_p5  ;;  %p2451_p12 = scmp.lt.s32.totalorder %s2442_s30, %s2442_s30 }
   0xd   : > { %p2433_p7 = pneg %p2584_p6  ;;  %p2452_p13 = por %p2451_p12, %p2450_p11 }
   0xf   : > { %p2445_p9 = pnand %p2443_p8, %p2433_p7 }
  0x11   : > { %p2446_p10 = pneg %p2445_p9 }
  0x13   : > { %p2453_p0 = pnand %p2452_p13, %p2446_p10 }
  0x15   : > { %2456 = shalt.err (!%p2453_p0)
}
  0x16   : > { %s2517_s6 = smov 128   ;;  %s2518_s7 = smov 8  }
  0x17   : > { %2391 = dma.hbm_to_vmem [thread:$0]  (!%p2584_p6), %s3371_s1, 2048, %s200_s26, [#allocation4], %s2517_s6, %s2517_s6, %s2518_s7  }
  0x18   : > { %s2468_s10 = scalar_lea.vmem %s222_s29, 2048  ;;  %p2476_p8 = scmp.lt.s32.totalorder %s222_s29, %s222_s29 }
  0x19   : > { %p2469_p1 = scmp.ne.s32.totalorder %s222_s29, %s2468_s10  ;;  %p2477_p9 = scmp.lt.s32.totalorder %s2468_s10, %s2468_s10 }
  0x1b   : > { %p2471_p2 = pnand %p2469_p1, %p2433_p7  ;;  %p2478_p11 = por %p2477_p9, %p2476_p8 }
  0x1d   : > { %p2472_p5 = pneg %p2471_p2 }
  0x1f   : > { %p2479_p10 = pnand %p2478_p11, %p2472_p5 }
  0x21   : > { %2482 = shalt.err (!%p2479_p10)
}
  0x22   : > { %2394 = dma.hbm_to_vmem [thread:$0]  (!%p2584_p6), %s3373_s3, 2048, %s222_s29, [#allocation6], %s2517_s6, %s2517_s6, %s2518_s7  }
  0x23   : > { %247 = sbr.rel (%p2572_p3) target bundleno = 644 (0x284), region = 40 }
  0x28   : > { %2496 = dma.done.wait (%p2576_p4), [#allocation4], 2048  }
  0x29   : > { %2498 = vsyncadd (%p2576_p4), [#allocation4], 4294965248 }
  0x2a   : > { %2500 = dma.done.wait (%p2576_p4), [#allocation6], 2048  }
  0x2b   : > { %2502 = vsyncadd (%p2576_p4), [#allocation6], 4294965248  ;;  %v2519_v0 = vmov 0.0   ;;  %vm2520_vm0 = vmmov 0   ;;  %p280_p3 = scmp.lt.s32.totalorder %s2505_s18, 1  ;;  %v313_v1 = vld [vmem:[#allocation3 + $0x78] sm:$0xff] }
  0x2c   : > { %1960 = vmatprep.subr.mxu0 %v2519_v0  ;;  %1995 = vmatprep.subr.mxu1 %v2519_v0  ;;  %v312_v2 = vld [vmem:[#allocation3 + $0x70] sm:$0xff]  ;;  %v311_v3 = vld [vmem:[#allocation3 + $0x68] sm:$0xff]  ;;  %v2623_v4 = vand.u32 4294901760, %v313_v1  ;;  %v310_v7 = vld [vmem:[#allocation3 + $0x60] sm:$0xff] }
  0x2d   : > { %1992 = vmatprep.mubr.msk.f32.mxu0 %vm2520_vm0, %v2519_v0  ;;  %2027 = vmatprep.mubr.msk.f32.mxu1 %vm2520_vm0, %v2519_v0  ;;  %v2625_v5 = vand.u32 4294901760, %v312_v2  ;;  %v2627_v6 = vand.u32 4294901760, %v311_v3  ;;  %v309_v8 = vld [vmem:[#allocation3 + $0x58] sm:$0xff]  ;;  %v308_v9 = vld [vmem:[#allocation3 + $0x50] sm:$0xff]  ;;  %v2629_v10 = vand.u32 4294901760, %v310_v7  ;;  %v307_v13 = vld [vmem:[#allocation3 + $0x48] sm:$0xff] }
  0x2e   : > { %v2631_v11 = vand.u32 4294901760, %v309_v8  ;;  %v2633_v12 = vand.u32 4294901760, %v308_v9  ;;  %v306_v14 = vld [vmem:[#allocation3 + $0x40] sm:$0xff]  ;;  %s3398_s18 = smov (!%p280_p3, %s2505_s18), 1  ;;  %1961 = vmatpush3.msra.mxu0 %v2623_v4  ;;  %v2642_v15 = vsub.f32 %v313_v1, %v2623_v4  ;;  %v2647_v17 = vand.u32 4294901760, %v307_v13  ;;  %v305_v19 = vld [vmem:[#allocation3 + $0x38] sm:$0xff] }
  0x2f   : > { %v2645_v16 = vsub.f32 %v312_v2, %v2625_v5  ;;  %v2650_v18 = vsub.f32 %v311_v3, %v2627_v6  ;;  %1962 = vmatprep.subr.mxu0 %v2519_v0  ;;  %v2654_v20 = vsub.f32 %v310_v7, %v2629_v10  ;;  %v2663_v25 = vand.u32 4294901760, %v306_v14  ;;  %v304_v26 = vld [vmem:[#allocation3 + $0x30] sm:$0xff]  ;;  %s1750_s13 = sshll.u32 %s3398_s18, 3  ;;  %v303_v36 = vld [vmem:[#allocation3 + $0x28] sm:$0xff]  ;;  %v302_v41 = vld [vmem:[#allocation3 + $0x20] sm:$0xff] }
  0x30   : > { %v2657_v21 = vsub.f32 %v309_v8, %v2631_v11  ;;  %1963 = vmatpush3.msra.mxu0 %v2625_v5  ;;  %v415_v22 = vand.u32 4294901760, %v2642_v15  ;;  %v2667_v28 = vand.u32 4294901760, %v305_v19  ;;  %v2671_v30 = vsub.f32 %v308_v9, %v2633_v12  ;;  %s283_s16 = scalar_lea.vmem %s3370_s0, %s1750_s13  ;;  %v301_v49 = vld [vmem:[#allocation3 + $0x18] sm:$0xff]  ;;  %v300_v54 = vld [vmem:[#allocation3 + $0x10] sm:$0xff]  ;;  %v299_v60 = vld [vmem:[#allocation3 + $0x8] sm:$0xff]  ;;  %s291_s27 = scalar_lea.vmem %s3375_s5, %s1750_s13 }
  0x31   : > { %v422_v23 = vand.u32 4294901760, %v2645_v16  ;;  %v429_v24 = vand.u32 4294901760, %v2650_v18  ;;  %1964 = vmatprep.subr.mxu0 %v2519_v0  ;;  %v436_v27 = vand.u32 4294901760, %v2654_v20  ;;  %v2685_v34 = vsub.f32 %v307_v13, %v2647_v17  ;;  %v297_v50 = vld [vmem:[%s283_s16] sm:$0xff] }
  0x32   : > { %v443_v29 = vand.u32 4294901760, %v2657_v21  ;;  %1965 = vmatpush3.msra.mxu0 %v2627_v6  ;;  %v416_v31 = vsub.f32 %v2642_v15, %v415_v22  ;;  %v2688_v35 = vand.u32 4294901760, %v304_v26  ;;  %v450_v40 = vand.u32 4294901760, %v2671_v30  ;;  %v298_v7 = vld [vmem:[#allocation3] sm:$0xff] }
  0x33   : > { %v423_v32 = vsub.f32 %v2645_v16, %v422_v23  ;;  %v430_v33 = vsub.f32 %v2650_v18, %v429_v24  ;;  %1966 = vmatprep.subr.mxu0 %v2519_v0  ;;  %v437_v39 = vsub.f32 %v2654_v20, %v436_v27  ;;  %v2705_v43 = vsub.f32 %v306_v14, %v2663_v25 }
  0x34   : > { %1967 = vmatpush3.msra.mxu0 %v2629_v10  ;;  %v417_v37 = vand.u32 4294901760, %v416_v31  ;;  %v444_v42 = vsub.f32 %v2657_v21, %v443_v29  ;;  %v2708_v45 = vand.u32 4294901760, %v303_v36  ;;  %v457_v46 = vand.u32 4294901760, %v2685_v34 }
  0x35   : > { %v424_v38 = vand.u32 4294901760, %v423_v32  ;;  %1968 = vmatprep.subr.mxu0 %v2519_v0  ;;  %v431_v44 = vand.u32 4294901760, %v430_v33  ;;  %v2712_v47 = vsub.f32 %v305_v19, %v2667_v28  ;;  %v2716_v48 = vand.u32 4294901760, %v302_v41 }
  0x36   : > { %1969 = vmatpush3.msra.mxu0 %v2631_v11  ;;  %1996 = vmatpush3.msra.mxu1 %v417_v37  ;;  %v438_v51 = vand.u32 4294901760, %v437_v39  ;;  %v451_v52 = vsub.f32 %v2671_v30, %v450_v40  ;;  %v464_v53 = vand.u32 4294901760, %v2705_v43  ;;  %v2724_v55 = vsub.f32 %v304_v26, %v2688_v35 }
  0x37   : > { %1970 = vmatprep.subr.mxu0 %v2519_v0  ;;  %1997 = vmatprep.subr.mxu1 %v2519_v0  ;;  %v445_v56 = vand.u32 4294901760, %v444_v42  ;;  %v471_v57 = vand.u32 4294901760, %v2712_v47  ;;  %v458_v58 = vsub.f32 %v2685_v34, %v457_v46  ;;  %v2733_v59 = vand.u32 4294901760, %v301_v49 }
  0x38   : > { %1971 = vmatpush3.msra.mxu0 %v2633_v12  ;;  %1998 = vmatpush3.msra.mxu1 %v424_v38  ;;  %v2736_v61 = vsub.f32 %v303_v36, %v2708_v45  ;;  %v2738_v62 = vand.u32 4294901760, %v297_v50  ;;  %v2742_v63 = vand.u32 4294901760, %v300_v54  ;;  %v452_v1 = vand.u32 4294901760, %v451_v52 }
  0x39   : > { %1972 = vmatprep.subr.mxu0 %v2519_v0  ;;  %1999 = vmatprep.subr.mxu1 %v2519_v0  ;;  %v465_v2 = vsub.f32 %v2705_v43, %v464_v53  ;;  %v478_v3 = vand.u32 4294901760, %v2724_v55  ;;  %v2750_v8 = vsub.f32 %v302_v41, %v2716_v48  ;;  %v472_v9 = vsub.f32 %v2712_v47, %v471_v57 }
  0x3a   : > { %1973 = vmatpush3.msra.mxu0 %v2647_v17  ;;  %2000 = vmatpush3.msra.mxu1 %v431_v44  ;;  %v2757_v13 = vand.u32 4294901760, %v299_v60  ;;  %v459_v14 = vand.u32 4294901760, %v458_v58  ;;  %v485_v19 = vand.u32 4294901760, %v2736_v61  ;;  %v2762_v26 = vsub.f32 %v297_v50, %v2738_v62 }
  0x3b   : > { %1974 = vmatprep.subr.mxu0 %v2519_v0  ;;  %2001 = vmatprep.subr.mxu1 %v2519_v0  ;;  %v2765_v31 = vsub.f32 %v301_v49, %v2733_v59  ;;  %v2769_v32 = vand.u32 4294901760, %v298_v7  ;;  %v466_v33 = vand.u32 4294901760, %v465_v2  ;;  %v479_v36 = vsub.f32 %v2724_v55, %v478_v3 }
  0x3c   : > { %1975 = vmatpush3.msra.mxu0 %v2663_v25  ;;  %2002 = vmatpush3.msra.mxu1 %v438_v51  ;;  %v492_v37 = vand.u32 4294901760, %v2750_v8  ;;  %v2777_v38 = vsub.f32 %v300_v54, %v2742_v63  ;;  %v473_v39 = vand.u32 4294901760, %v472_v9  ;;  %v486_v41 = vsub.f32 %v2736_v61, %v485_v19 }
  0x3d   : > { %1976 = vmatprep.subr.mxu0 %v2519_v0  ;;  %2003 = vmatprep.subr.mxu1 %v2519_v0  ;;  %v404_v42 = vand.u32 4294901760, %v2762_v26  ;;  %v499_v44 = vand.u32 4294901760, %v2765_v31  ;;  %v2788_v49 = vsub.f32 %v299_v60, %v2757_v13  ;;  %v480_v50 = vand.u32 4294901760, %v479_v36 }
  0x3e   : > { %1977 = vmatpush3.msra.mxu0 %v2667_v28  ;;  %2004 = vmatpush3.msra.mxu1 %v445_v56  ;;  %v493_v51 = vsub.f32 %v2750_v8, %v492_v37  ;;  %v506_v52 = vand.u32 4294901760, %v2777_v38  ;;  %v2798_v54 = vsub.f32 %v298_v7, %v2769_v32  ;;  %v487_v56 = vand.u32 4294901760, %v486_v41 }
  0x3f   : > { %1978 = vmatprep.subr.mxu0 %v2519_v0  ;;  %2005 = vmatprep.subr.mxu1 %v2519_v0  ;;  %v405_v58 = vsub.f32 %v2762_v26, %v404_v42  ;;  %v500_v60 = vsub.f32 %v2765_v31, %v499_v44 }
  0x40   : > { %1979 = vmatpush3.msra.mxu0 %v2688_v35  ;;  %2006 = vmatpush3.msra.mxu1 %v452_v1  ;;  %v513_v1 = vand.u32 4294901760, %v2788_v49  ;;  %v494_v2 = vand.u32 4294901760, %v493_v51  ;;  %v507_v7 = vsub.f32 %v2777_v38, %v506_v52  ;;  %v520_v9 = vand.u32 4294901760, %v2798_v54 }
  0x41   : > { %1980 = vmatprep.subr.mxu0 %v2519_v0  ;;  %2007 = vmatprep.subr.mxu1 %v2519_v0 }
  0x42   : > { %1981 = vmatpush3.msra.mxu0 %v2708_v45  ;;  %2008 = vmatpush3.msra.mxu1 %v459_v14  ;;  %v406_v14 = vand.u32 4294901760, %v405_v58  ;;  %v514_v36 = vsub.f32 %v2788_v49, %v513_v1  ;;  %v521_v41 = vsub.f32 %v2798_v54, %v520_v9  ;;  %v973_v58 = vld [vmem:[#allocation5 + $0x28] sm:$0xff] }
  0x43   : > { %1982 = vmatprep.subr.mxu0 %v2519_v0  ;;  %2009 = vmatprep.subr.mxu1 %v2519_v0 }
  0x44   : > { %1983 = vmatpush3.msra.mxu0 %v2716_v48  ;;  %2010 = vmatpush3.msra.mxu1 %v466_v33  ;;  %v501_v33 = vand.u32 4294901760, %v500_v60  ;;  %v522_v51 = vand.u32 4294901760, %v521_v41 }
  0x45   : > { %1984 = vmatprep.subr.mxu0 %v2519_v0  ;;  %2011 = vmatprep.subr.mxu1 %v2519_v0 }
  0x46   : > { %1985 = vmatpush3.msra.mxu0 %v2733_v59  ;;  %2012 = vmatpush3.msra.mxu1 %v473_v39  ;;  %v508_v39 = vand.u32 4294901760, %v507_v7  ;;  %v3099_v7 = vand.u32 4294901760, %v973_v58 }
  0x47   : > { %1986 = vmatprep.subr.mxu0 %v2519_v0  ;;  %2013 = vmatprep.subr.mxu1 %v2519_v0 }
  0x48   : > { %1987 = vmatpush3.msra.mxu0 %v2742_v63  ;;  %2014 = vmatpush3.msra.mxu1 %v480_v50  ;;  %v515_v50 = vand.u32 4294901760, %v514_v36 }
  0x49   : > { %1988 = vmatprep.subr.mxu0 %v2519_v0  ;;  %2015 = vmatprep.subr.mxu1 %v2519_v0 }
  0x4a   : > { %1989 = vmatpush3.msra.mxu0 %v2757_v13  ;;  %2016 = vmatpush3.msra.mxu1 %v487_v56 }
  0x4b   : > { %1990 = vmatprep.subr.mxu0 %v2519_v0  ;;  %2017 = vmatprep.subr.mxu1 %v2519_v0 }
  0x4c   : > { %1991 = vmatpush3.msra.mxu0 %v2769_v32  ;;  %2018 = vmatpush3.msra.mxu1 %v494_v2 }
  0x4d   : > { %2019 = vmatprep.subr.mxu1 %v2519_v0  ;;  %2030 = vmatprep.subr.mxu0 %v2519_v0 }
  0x4e   : > { %1993 = vmatmul.mubr.f32.vlgmr.msra.gmra.mxu0 %v406_v14  ;;  %2020 = vmatpush3.msra.mxu1 %v501_v33  ;;  %v972_v14 = vld [vmem:[#allocation5 + $0x20] sm:$0xff] }
  0x4f   : > { %2031 = vmatpush3.msra.mxu0 %v2642_v15  ;;  %2021 = vmatprep.subr.mxu1 %v2519_v0  ;;  %v3113_v41 = vand.u32 4294901760, %v972_v14 }
  0x50   : > { %2032 = vmatprep.subr.mxu0 %v2519_v0  ;;  %2022 = vmatpush3.msra.mxu1 %v508_v39  ;;  %v3111_v39 = vsub.f32 %v973_v58, %v3099_v7 }
  0x51   : > { %2033 = vmatpush3.msra.mxu0 %v2645_v16  ;;  %2023 = vmatprep.subr.mxu1 %v2519_v0 }
  0x52   : > { %2034 = vmatprep.subr.mxu0 %v2519_v0  ;;  %2024 = vmatpush3.msra.mxu1 %v515_v50 }
  0x53   : > { %2035 = vmatpush3.msra.mxu0 %v2650_v18  ;;  %2025 = vmatprep.subr.mxu1 %v2519_v0  ;;  %v980_v18 = vld [vmem:[#allocation5 + $0x60] sm:$0xff] }
  0x54   : > { %2036 = vmatprep.subr.mxu0 %v2519_v0  ;;  %2026 = vmatpush3.msra.mxu1 %v522_v51  ;;  %v971_v51 = vld [vmem:[#allocation5 + $0x18] sm:$0xff] }
  0x55   : > { %2037 = vmatpush3.msra.mxu0 %v2654_v20  ;;  %2028 = vmatmul.mubr.f32.vlgmr.msra.gmra.mxu1 %v2738_v62 }
  0x56   : > { %2038 = vmatprep.subr.mxu0 %v2519_v0  ;;  %2065 = vmatprep.subr.mxu1 %v2519_v0 }
  0x57   : > { %2039 = vmatpush3.msra.mxu0 %v2657_v21  ;;  %2066 = vmatpush3.msra.mxu1 %v2623_v4 }
  0x58   : > { %2040 = vmatprep.subr.mxu0 %v2519_v0  ;;  %2067 = vmatprep.subr.mxu1 %v2519_v0 }
  0x59   : > { %2041 = vmatpush3.msra.mxu0 %v2671_v30  ;;  %2068 = vmatpush3.msra.mxu1 %v2625_v5 }
  0x5a   : > { %2042 = vmatprep.subr.mxu0 %v2519_v0  ;;  %2069 = vmatprep.subr.mxu1 %v2519_v0 }
  0x5b   : > { %2043 = vmatpush3.msra.mxu0 %v2685_v34  ;;  %2070 = vmatpush3.msra.mxu1 %v2627_v6  ;;  %v978_v34 = vld [vmem:[#allocation5 + $0x50] sm:$0xff] }
  0x5c   : > { %2044 = vmatprep.subr.mxu0 %v2519_v0  ;;  %2071 = vmatprep.subr.mxu1 %v2519_v0 }
  0x5d   : > { %2045 = vmatpush3.msra.mxu0 %v2705_v43  ;;  %2072 = vmatpush3.msra.mxu1 %v2629_v10 }
  0x5e   : > { %2046 = vmatprep.subr.mxu0 %v2519_v0  ;;  %2073 = vmatprep.subr.mxu1 %v2519_v0 }
  0x5f   : > { %2047 = vmatpush3.msra.mxu0 %v2712_v47  ;;  %2074 = vmatpush3.msra.mxu1 %v2631_v11  ;;  %v977_v47 = vld [vmem:[#allocation5 + $0x48] sm:$0xff] }
  0x60   : > { %2048 = vmatprep.subr.mxu0 %v2519_v0  ;;  %2075 = vmatprep.subr.mxu1 %v2519_v0 }
  0x61   : > { %2049 = vmatpush3.msra.mxu0 %v2724_v55  ;;  %2076 = vmatpush3.msra.mxu1 %v2633_v12 }
  0x62   : > { %2050 = vmatprep.subr.mxu0 %v2519_v0  ;;  %2077 = vmatprep.subr.mxu1 %v2519_v0 }
  0x63   : > { %2051 = vmatpush3.msra.mxu0 %v2736_v61  ;;  %2078 = vmatpush3.msra.mxu1 %v2647_v17  ;;  %v976_v61 = vld [vmem:[#allocation5 + $0x40] sm:$0xff] }
  0x64   : > { %2052 = vmatprep.subr.mxu0 %v2519_v0  ;;  %2079 = vmatprep.subr.mxu1 %v2519_v0 }
  0x65   : > { %2053 = vmatpush3.msra.mxu0 %v2750_v8  ;;  %2080 = vmatpush3.msra.mxu1 %v2663_v25  ;;  %v3063_v8 = vand.u32 4294901760, %v976_v61 }
  0x66   : > { %2054 = vmatprep.subr.mxu0 %v2519_v0  ;;  %2081 = vmatprep.subr.mxu1 %v2519_v0 }
  0x67   : > { %2055 = vmatpush3.msra.mxu0 %v2765_v31  ;;  %2082 = vmatpush3.msra.mxu1 %v2667_v28 }
  0x68   : > { %2056 = vmatprep.subr.mxu0 %v2519_v0  ;;  %2083 = vmatprep.subr.mxu1 %v2519_v0 }
  0x69   : > { %2057 = vmatpush3.msra.mxu0 %v2777_v38  ;;  %2084 = vmatpush3.msra.mxu1 %v2688_v35 }
  0x6a   : > { %2058 = vmatprep.subr.mxu0 %v2519_v0  ;;  %2085 = vmatprep.subr.mxu1 %v2519_v0 }
  0x6b   : > { %2059 = vmatpush3.msra.mxu0 %v2788_v49  ;;  %2086 = vmatpush3.msra.mxu1 %v2708_v45 }
  0x6c   : > { %2060 = vmatprep.subr.mxu0 %v2519_v0  ;;  %2087 = vmatprep.subr.mxu1 %v2519_v0 }
  0x6d   : > { %2061 = vmatpush3.msra.mxu0 %v2798_v54  ;;  %2062 = vmatprep.mubr.msk.f32.mxu0 %vm2520_vm0, %v2519_v0 }
  0x6e   : > { %2088 = vmatpush3.msra.mxu1 %v2716_v48  ;;  %2063 = vmatmul.mubr.f32.vlgmr.msra.gmra.mxu0 %v2762_v26 }
  0x6f   : > { %2089 = vmatprep.subr.mxu1 %v2519_v0  ;;  %2100 = vmatprep.subr.mxu0 %v2519_v0 }
  0x70   : > { %2090 = vmatpush3.msra.mxu1 %v2733_v59  ;;  %2101 = vmatpush3.msra.mxu0 %v415_v22 }
  0x71   : > { %2091 = vmatprep.subr.mxu1 %v2519_v0  ;;  %2102 = vmatprep.subr.mxu0 %v2519_v0 }
  0x72   : > { %2092 = vmatpush3.msra.mxu1 %v2742_v63  ;;  %2103 = vmatpush3.msra.mxu0 %v422_v23  ;;  %v3021_v23 = vand.u32 4294901760, %v980_v18 }
  0x73   : > { %2093 = vmatprep.subr.mxu1 %v2519_v0  ;;  %2104 = vmatprep.subr.mxu0 %v2519_v0 }
  0x74   : > { %2094 = vmatpush3.msra.mxu1 %v2757_v13  ;;  %2105 = vmatpush3.msra.mxu0 %v429_v24  ;;  %v979_v24 = vld [vmem:[#allocation5 + $0x58] sm:$0xff] }
  0x75   : > { %2095 = vmatprep.subr.mxu1 %v2519_v0  ;;  %2106 = vmatprep.subr.mxu0 %v2519_v0  ;;  %v3033_v30 = vand.u32 4294901760, %v979_v24 }
  0x76   : > { %2096 = vmatpush3.msra.mxu1 %v2769_v32  ;;  %2097 = vmatprep.mubr.msk.f32.mxu1 %vm2520_vm0, %v2519_v0 }
  0x77   : > { %2107 = vmatpush3.msra.mxu0 %v436_v27  ;;  %2098 = vmatmul.mubr.f32.vlgmr.msra.gmra.mxu1 %v404_v42  ;;  %v974_v42 = vld [vmem:[#allocation5 + $0x30] sm:$0xff] }
  0x78   : > { %2108 = vmatprep.subr.mxu0 %v2519_v0  ;;  %2135 = vmatprep.subr.mxu1 %v2519_v0  ;;  %v3091_v56 = vand.u32 4294901760, %v974_v42 }
  0x79   : > { %2109 = vmatpush3.msra.mxu0 %v443_v29  ;;  %2136 = vmatpush3.msra.mxu1 %v2623_v4  ;;  %v983_v4 = vld [vmem:[#allocation5 + $0x78] sm:$0xff]  ;;  %v3030_v29 = vsub.f32 %v980_v18, %v3021_v23  ;;  %v3123_v18 = vand.u32 4294901760, %v971_v51 }
  0x7a   : > { %2110 = vmatprep.subr.mxu0 %v2519_v0  ;;  %2137 = vmatprep.subr.mxu1 %v2519_v0 }
  0x7b   : > { %2111 = vmatpush3.msra.mxu0 %v450_v40  ;;  %2138 = vmatpush3.msra.mxu1 %v2625_v5  ;;  %v2997_v5 = vand.u32 4294901760, %v983_v4  ;;  %v1099_v43 = vand.u32 4294901760, %v3030_v29 }
  0x7c   : > { %2112 = vmatprep.subr.mxu0 %v2519_v0  ;;  %2139 = vmatprep.subr.mxu1 %v2519_v0 }
  0x7d   : > { %2113 = vmatpush3.msra.mxu0 %v457_v46  ;;  %2140 = vmatpush3.msra.mxu1 %v2627_v6  ;;  %v982_v6 = vld [vmem:[#allocation5 + $0x70] sm:$0xff]  ;;  %v3044_v46 = vsub.f32 %v979_v24, %v3033_v30 }
  0x7e   : > { %2114 = vmatprep.subr.mxu0 %v2519_v0  ;;  %2141 = vmatprep.subr.mxu1 %v2519_v0  ;;  %v970_v24 = vld [vmem:[#allocation5 + $0x10] sm:$0xff] }
  0x7f   : > { %2115 = vmatpush3.msra.mxu0 %v464_v53  ;;  %2142 = vmatpush3.msra.mxu1 %v2629_v10  ;;  %v3000_v10 = vsub.f32 %v983_v4, %v2997_v5  ;;  %v1100_v53 = vsub.f32 %v3030_v29, %v1099_v43 }
  0x80   : > { %2116 = vmatprep.subr.mxu0 %v2519_v0  ;;  %2143 = vmatprep.subr.mxu1 %v2519_v0 }
  0x81   : > { %2117 = vmatpush3.msra.mxu0 %v471_v57  ;;  %2144 = vmatpush3.msra.mxu1 %v2631_v11  ;;  %v3002_v11 = vand.u32 4294901760, %v982_v6  ;;  %v1078_v15 = vand.u32 4294901760, %v3000_v10  ;;  %v3053_v57 = vand.u32 4294901760, %v977_v47 }
  0x82   : > { %2118 = vmatprep.subr.mxu0 %v2519_v0  ;;  %2145 = vmatprep.subr.mxu1 %v2519_v0 }
  0x83   : > { %2119 = vmatpush3.msra.mxu0 %v478_v3  ;;  %2146 = vmatpush3.msra.mxu1 %v2633_v12  ;;  %v981_v12 = vld [vmem:[#allocation5 + $0x68] sm:$0xff]  ;;  %v3008_v16 = vsub.f32 %v982_v6, %v3002_v11  ;;  %v1079_v20 = vsub.f32 %v3000_v10, %v1078_v15  ;;  %v3061_v3 = vsub.f32 %v977_v47, %v3053_v57  ;;  %v3381_v6 = vand.u32 4294901760, %v3111_v39 }
  0x84   : > { %2120 = vmatprep.subr.mxu0 %v2519_v0  ;;  %2147 = vmatprep.subr.mxu1 %v2519_v0  ;;  %v969_v47 = vld [vmem:[#allocation5 + $0x8] sm:$0xff] }
  0x85   : > { %2121 = vmatpush3.msra.mxu0 %v485_v19  ;;  %2148 = vmatpush3.msra.mxu1 %v2647_v17  ;;  %v3010_v17 = vand.u32 4294901760, %v981_v12  ;;  %v1085_v21 = vand.u32 4294901760, %v3008_v16  ;;  %v975_v19 = vld [vmem:[#allocation5 + $0x38] sm:$0xff]  ;;  %v1120_v31 = vand.u32 4294901760, %v3061_v3 }
  0x86   : > { %2122 = vmatprep.subr.mxu0 %v2519_v0  ;;  %2149 = vmatprep.subr.mxu1 %v2519_v0 }
  0x87   : > { %2123 = vmatpush3.msra.mxu0 %v492_v37  ;;  %2150 = vmatpush3.msra.mxu1 %v2663_v25  ;;  %v3019_v22 = vsub.f32 %v981_v12, %v3010_v17  ;;  %v1080_v25 = vand.u32 4294901760, %v1079_v20  ;;  %v1086_v27 = vsub.f32 %v3008_v16, %v1085_v21  ;;  %v3078_v37 = vand.u32 4294901760, %v975_v19 }
  0x88   : > { %2124 = vmatprep.subr.mxu0 %v2519_v0  ;;  %2151 = vmatprep.subr.mxu1 %v2519_v0  ;;  %v1121_v49 = vsub.f32 %v3061_v3, %v1120_v31  ;;  %v3121_v12 = vsub.f32 %v972_v14, %v3113_v41 }
  0x89   : > { %2125 = vmatpush3.msra.mxu0 %v499_v44  ;;  %2152 = vmatpush3.msra.mxu1 %v2667_v28  ;;  %v1092_v28 = vand.u32 4294901760, %v3019_v22  ;;  %v3088_v54 = vsub.f32 %v975_v19, %v3078_v37  ;;  %v968_v19 = vld [vmem:[#allocation5] sm:$0xff] }
  0x8a   : > { %2126 = vmatprep.subr.mxu0 %v2519_v0  ;;  %2153 = vmatprep.subr.mxu1 %v2519_v0  ;;  %v1122_v60 = vand.u32 4294901760, %v1121_v49 }
  0x8b   : > { %2127 = vmatpush3.msra.mxu0 %v506_v52  ;;  %2154 = vmatpush3.msra.mxu1 %v2688_v35  ;;  %v1087_v35 = vand.u32 4294901760, %v1086_v27  ;;  %v1093_v40 = vsub.f32 %v3019_v22, %v1092_v28  ;;  %v1134_v2 = vand.u32 4294901760, %v3088_v54  ;;  %v3380_v27 = vand.u32 4294901760, %v3121_v12 }
  0x8c   : > { %2128 = vmatprep.subr.mxu0 %v2519_v0  ;;  %2155 = vmatprep.subr.mxu1 %v2519_v0 }
  0x8d   : > { %2129 = vmatpush3.msra.mxu0 %v513_v1  ;;  %2156 = vmatpush3.msra.mxu1 %v2708_v45  ;;  %v3040_v45 = vand.u32 4294901760, %v978_v34  ;;  %v1135_v36 = vsub.f32 %v3088_v54, %v1134_v2 }
  0x8e   : > { %2130 = vmatprep.subr.mxu0 %v2519_v0  ;;  %2157 = vmatprep.subr.mxu1 %v2519_v0 }
  0x8f   : > { %2131 = vmatpush3.msra.mxu0 %v520_v9  ;;  %2132 = vmatprep.mubr.msk.f32.mxu0 %vm2520_vm0, %v2519_v0  ;;  %v3051_v55 = vsub.f32 %v978_v34, %v3040_v45  ;;  %v3103_v9 = vsub.f32 %v974_v42, %v3091_v56  ;;  %v1136_v4 = vand.u32 4294901760, %v1135_v36  ;;  %v3136_v34 = vsub.f32 %v971_v51, %v3123_v18 }
  0x90   : > { %2158 = vmatpush3.msra.mxu1 %v2716_v48  ;;  %2133 = vmatmul.mubr.f32.vlgmr.msra.gmra.mxu0 %v2738_v62  ;;  %v1094_v48 = vand.u32 4294901760, %v1093_v40 }
  0x91   : > { %2159 = vmatprep.subr.mxu1 %v2519_v0  ;;  %2167 = vmatprep.mubr.msk.f32.mxu1 %vm2520_vm0, %v2519_v0  ;;  %v3382_v50 = vand.u32 4294901760, %v3103_v9 }
  0x92   : > { %2160 = vmatpush3.msra.mxu1 %v2733_v59  ;;  %2170 = vmatprep.subr.mxu0 %v2519_v0  ;;  %v1106_v59 = vand.u32 4294901760, %v3044_v46 }
  0x93   : > { %2161 = vmatprep.subr.mxu1 %v2519_v0  ;;  %2202 = vmatprep.mubr.msk.f32.mxu0 %vm2520_vm0, %v2519_v0  ;;  %v1142_v20 = vsub.f32 %v3103_v9, %v3382_v50 }
  0x94   : > { %2162 = vmatpush3.msra.mxu1 %v2742_v63  ;;  %2171 = vmatpush3.msra.mxu0 %v2997_v5  ;;  %v1113_v63 = vand.u32 4294901760, %v3051_v55 }
  0x95   : > { %2163 = vmatprep.subr.mxu1 %v2519_v0  ;;  %2172 = vmatprep.subr.mxu0 %v2519_v0  ;;  %v1143_v40 = vand.u32 4294901760, %v1142_v20 }
  0x96   : > { %2164 = vmatpush3.msra.mxu1 %v2757_v13  ;;  %2173 = vmatpush3.msra.mxu0 %v3002_v11  ;;  %v1107_v13 = vsub.f32 %v3044_v46, %v1106_v59  ;;  %v1114_v26 = vsub.f32 %v3051_v55, %v1113_v63 }
  0x97   : > { %2165 = vmatprep.subr.mxu1 %v2519_v0  ;;  %2174 = vmatprep.subr.mxu0 %v2519_v0 }
  0x98   : > { %2166 = vmatpush3.msra.mxu1 %v2769_v32  ;;  %2175 = vmatpush3.msra.mxu0 %v3010_v17  ;;  %v3076_v32 = vsub.f32 %v976_v61, %v3063_v8  ;;  %v1108_v38 = vand.u32 4294901760, %v1107_v13  ;;  %v1115_v44 = vand.u32 4294901760, %v1114_v26  ;;  %v3379_v61 = vand.u32 4294901760, %v3136_v34 }
  0x99   : > { %2168 = vmatmul.mubr.f32.vlgmr.msra.gmra.mxu1 %v2738_v62  ;;  %2205 = vmatprep.subr.mxu1 %v2519_v0  ;;  %v1101_v62 = vand.u32 4294901760, %v1100_v53  ;;  %v1156_v53 = vsub.f32 %v3121_v12, %v3380_v27  ;;  %v3151_v13 = vand.u32 4294901760, %v969_v47 }
  0x9a   : > { %2237 = vmatprep.mubr.msk.f32.mxu1 %vm2520_vm0, %v2519_v0  ;;  %2176 = vmatprep.subr.mxu0 %v2519_v0  ;;  %v1127_v52 = vand.u32 4294901760, %v3076_v32 }
  0x9b   : > { %2177 = vmatpush3.msra.mxu0 %v3021_v23  ;;  %2206 = vmatpush3.msra.mxu1 %v1080_v25  ;;  %v1149_v25 = vsub.f32 %v3111_v39, %v3381_v6  ;;  %v1157_v26 = vand.u32 4294901760, %v1156_v53  ;;  %v3163_v49 = vsub.f32 %v969_v47, %v3151_v13 }
  0x9c   : > { %2178 = vmatprep.subr.mxu0 %v2519_v0  ;;  %2207 = vmatprep.subr.mxu1 %v2519_v0  ;;  %v1128_v1 = vsub.f32 %v3076_v32, %v1127_v52 }
  0x9d   : > { %2179 = vmatpush3.msra.mxu0 %v3033_v30  ;;  %2208 = vmatpush3.msra.mxu1 %v1087_v35  ;;  %v3138_v35 = vand.u32 4294901760, %v970_v24  ;;  %v3377_v14 = vand.u32 4294901760, %v3163_v49 }
  0x9e   : > { %2180 = vmatprep.subr.mxu0 %v2519_v0  ;;  %2209 = vmatprep.subr.mxu1 %v2519_v0  ;;  %v1129_v33 = vand.u32 4294901760, %v1128_v1 }
  0x9f   : > { %2181 = vmatpush3.msra.mxu0 %v3040_v45  ;;  %2210 = vmatpush3.msra.mxu1 %v1094_v48  ;;  %v1150_v48 = vand.u32 4294901760, %v1149_v25  ;;  %v1177_v51 = vsub.f32 %v3163_v49, %v3377_v14 }
  0xa0   : > { %2182 = vmatprep.subr.mxu0 %v2519_v0  ;;  %2211 = vmatprep.subr.mxu1 %v2519_v0 }
  0xa1   : > { %2183 = vmatpush3.msra.mxu0 %v3053_v57  ;;  %2212 = vmatpush3.msra.mxu1 %v1101_v62  ;;  %v3148_v62 = vsub.f32 %v970_v24, %v3138_v35  ;;  %v1178_v20 = vand.u32 4294901760, %v1177_v51 }
  0xa2   : > { %2184 = vmatprep.subr.mxu0 %v2519_v0  ;;  %2213 = vmatprep.subr.mxu1 %v2519_v0 }
  0xa3   : > { %2185 = vmatpush3.msra.mxu0 %v3063_v8  ;;  %2214 = vmatpush3.msra.mxu1 %v1108_v38  ;;  %v1163_v38 = vsub.f32 %v3136_v34, %v3379_v61  ;;  %v3378_v42 = vand.u32 4294901760, %v3148_v62 }
  0xa4   : > { %2186 = vmatprep.subr.mxu0 %v2519_v0  ;;  %2215 = vmatprep.subr.mxu1 %v2519_v0 }
  0xa5   : > { %2187 = vmatpush3.msra.mxu0 %v3078_v37  ;;  %2216 = vmatpush3.msra.mxu1 %v1115_v44  ;;  %v3159_v44 = vand.u32 4294901760, %v968_v19  ;;  %v1164_v58 = vand.u32 4294901760, %v1163_v38 }
  0xa6   : > { %2188 = vmatprep.subr.mxu0 %v2519_v0  ;;  %2217 = vmatprep.subr.mxu1 %v2519_v0 }
  0xa7   : > { %2189 = vmatpush3.msra.mxu0 %v3091_v56  ;;  %2218 = vmatpush3.msra.mxu1 %v1122_v60  ;;  %v1170_v60 = vsub.f32 %v3148_v62, %v3378_v42  ;;  %v3171_v1 = vsub.f32 %v968_v19, %v3159_v44 }
  0xa8   : > { %2190 = vmatprep.subr.mxu0 %v2519_v0  ;;  %2219 = vmatprep.subr.mxu1 %v2519_v0 }
  0xa9   : > { %2191 = vmatpush3.msra.mxu0 %v3099_v7  ;;  %2220 = vmatpush3.msra.mxu1 %v1129_v33  ;;  %v1171_v33 = vand.u32 4294901760, %v1170_v60  ;;  %v3376_v36 = vand.u32 4294901760, %v3171_v1 }
  0xaa   : > { %2192 = vmatprep.subr.mxu0 %v2519_v0  ;;  %2221 = vmatprep.subr.mxu1 %v2519_v0 }
  0xab   : > { %2193 = vmatpush3.msra.mxu0 %v3113_v41  ;;  %2222 = vmatpush3.msra.mxu1 %v1136_v4  ;;  %v1184_v4 = vsub.f32 %v3171_v1, %v3376_v36 }
  0xac   : > { %2194 = vmatprep.subr.mxu0 %v2519_v0  ;;  %2223 = vmatprep.subr.mxu1 %v2519_v0 }
  0xad   : > { %2195 = vmatpush3.msra.mxu0 %v3123_v18  ;;  %2224 = vmatpush3.msra.mxu1 %v1143_v40  ;;  %v1185_v24 = vand.u32 4294901760, %v1184_v4 }
  0xae   : > { %2196 = vmatprep.subr.mxu0 %v2519_v0  ;;  %2225 = vmatprep.subr.mxu1 %v2519_v0 }
  0xaf   : > { %2197 = vmatpush3.msra.mxu0 %v3138_v35  ;;  %2226 = vmatpush3.msra.mxu1 %v1150_v48 }
  0xb0   : > { %2198 = vmatprep.subr.mxu0 %v2519_v0  ;;  %2227 = vmatprep.subr.mxu1 %v2519_v0 }
  0xb1   : > { %2199 = vmatpush3.msra.mxu0 %v3151_v13  ;;  %2228 = vmatpush3.msra.mxu1 %v1157_v26 }
  0xb2   : > { %2200 = vmatprep.subr.mxu0 %v2519_v0  ;;  %2229 = vmatprep.subr.mxu1 %v2519_v0 }
  0xb3   : > { %2201 = vmatpush3.msra.mxu0 %v3159_v44  ;;  %2230 = vmatpush3.msra.mxu1 %v1164_v58  ;;  %v1752_v58 = vld [vmem:[%s3372_s2] ss:$0 sm:$0xff] }
  0xb4   : > { %2240 = vmatprep.subr.mxu0 %v2519_v0  ;;  %2231 = vmatprep.subr.mxu1 %v2519_v0 }
  0xb5   : > { %2232 = vmatpush3.msra.mxu1 %v1171_v33 }
  0xb6   : > { %2233 = vmatprep.subr.mxu1 %v2519_v0 }
  0xb7   : > { %2234 = vmatpush3.msra.mxu1 %v1178_v20 }
  0xb8   : > { %2235 = vmatprep.subr.mxu1 %v2519_v0 }
  0xb9   : > { %2236 = vmatpush3.msra.mxu1 %v1185_v24 }
  0xba   : > { %2275 = vmatprep.subr.mxu1 %v2519_v0 }
 0x10e   : > { %v408_v25 = vpop.f32.mrf.mxu0 }
 0x10f   : > { %v409_v60 = vadd.f32 %v1752_v58, %v408_v25 }
 0x110   : > { %v1994_v40 = vpop.f32.mrf.mxu0 }
 0x115   : > { %v559_v47 = vpop.f32.mrf.mxu1 }
 0x116   : > { %v560_v51 = vadd.f32 %v559_v47, %v409_v60 }
 0x117   : > { %v2029_v48 = vpop.f32.mrf.mxu1 }
 0x12e   : > { %v663_v53 = vpop.f32.mrf.mxu0 }
 0x12f   : > { %v664_v20 = vadd.f32 %v663_v53, %v560_v51 }
 0x130   : > { %v2064_v19 = vpop.f32.mrf.mxu0 }
 0x137   : > { %v752_v26 = vpop.f32.mrf.mxu1 }
 0x138   : > { %v753_v24 = vadd.f32 %v752_v26, %v664_v20 }
 0x139   : > { %v2099_v38 = vpop.f32.mrf.mxu1 }
 0x150   : > { %v871_v33 = vpop.f32.mrf.mxu0 }
 0x151   : > { %v872_v36 = vadd.f32 %v871_v33, %v753_v24 }
 0x152   : > { %v2134_v4 = vpop.f32.mrf.mxu0 }
 0x159   : > { %v958_v14 = vpop.f32.mrf.mxu1 }
 0x15a   : > { %v959_v42 = vadd.f32 %v958_v14, %v872_v36 }
 0x15b   : > { %v2169_v40 = vpop.f32.mrf.mxu1 }
 0x15c   : > { %v963_v61 = vmul.f32 0.70710677, %v959_v42  ;;  %v962_v19 = vmul.f32 0.5, %v959_v42 }
 0x15e   : > { %2429 = verf.f32 %v963_v61 }
 0x16b   : > { %v2430_v48 = vpop.eup %2429 }
 0x16c   : > { %v965_v27 = vadd.f32 1.0, %v2430_v48 }
 0x16e   : > { %v966_v38 = vmul.f32 %v965_v27, %v962_v19 }
 0x170   : > { %v3192_v6 = vand.u32 4294901760, %v966_v38 }
 0x172   : > { %v3195_v50 = vsub.f32 %v966_v38, %v3192_v6  ;;  %2238 = vmatmul.mubr.f32.vlgmr.msra.gmra.mxu1 %v3192_v6 }
 0x173   : > { %2276 = vmatpush3.msra.mxu1 %v2997_v5  ;;  %2307 = vmatprep.mubr.msk.f32.mxu1 %vm2520_vm0, %v2519_v0 }
 0x174   : > { %2277 = vmatprep.subr.mxu1 %v2519_v0  ;;  %v1067_v61 = vand.u32 4294901760, %v3195_v50 }
 0x175   : > { %2278 = vmatpush3.msra.mxu1 %v3002_v11 }
 0x176   : > { %2279 = vmatprep.subr.mxu1 %v2519_v0  ;;  %v1068_v27 = vsub.f32 %v3195_v50, %v1067_v61 }
 0x177   : > { %2280 = vmatpush3.msra.mxu1 %v3010_v17 }
 0x178   : > { %2281 = vmatprep.subr.mxu1 %v2519_v0  ;;  %v1069_v42 = vand.u32 4294901760, %v1068_v27 }
 0x179   : > { %2282 = vmatpush3.msra.mxu1 %v3021_v23 }
 0x17a   : > { %2283 = vmatprep.subr.mxu1 %v2519_v0  ;;  %2203 = vmatmul.mubr.f32.vlgmr.msra.gmra.mxu0 %v1069_v42 }
 0x17b   : > { %2241 = vmatpush3.msra.mxu0 %v3000_v10  ;;  %2284 = vmatpush3.msra.mxu1 %v3033_v30  ;;  %v3387_v10 = vand.u32 4294901760, %v3111_v39 }
 0x17c   : > { %2242 = vmatprep.subr.mxu0 %v2519_v0  ;;  %2285 = vmatprep.subr.mxu1 %v2519_v0 }
 0x17d   : > { %2243 = vmatpush3.msra.mxu0 %v3008_v16  ;;  %2286 = vmatpush3.msra.mxu1 %v3040_v45  ;;  %v3390_v16 = vand.u32 4294901760, %v3148_v62 }
 0x17e   : > { %2244 = vmatprep.subr.mxu0 %v2519_v0  ;;  %2287 = vmatprep.subr.mxu1 %v2519_v0 }
 0x17f   : > { %2245 = vmatpush3.msra.mxu0 %v3019_v22  ;;  %2288 = vmatpush3.msra.mxu1 %v3053_v57 }
 0x180   : > { %2246 = vmatprep.subr.mxu0 %v2519_v0  ;;  %2289 = vmatprep.subr.mxu1 %v2519_v0 }
 0x181   : > { %2247 = vmatpush3.msra.mxu0 %v3030_v29  ;;  %2290 = vmatpush3.msra.mxu1 %v3063_v8 }
 0x182   : > { %2248 = vmatprep.subr.mxu0 %v2519_v0  ;;  %2291 = vmatprep.subr.mxu1 %v2519_v0 }
 0x183   : > { %2249 = vmatpush3.msra.mxu0 %v3044_v46  ;;  %2292 = vmatpush3.msra.mxu1 %v3078_v37 }
 0x184   : > { %2250 = vmatprep.subr.mxu0 %v2519_v0  ;;  %2293 = vmatprep.subr.mxu1 %v2519_v0 }
 0x185   : > { %2251 = vmatpush3.msra.mxu0 %v3051_v55  ;;  %2294 = vmatpush3.msra.mxu1 %v3091_v56 }
 0x186   : > { %2252 = vmatprep.subr.mxu0 %v2519_v0  ;;  %2295 = vmatprep.subr.mxu1 %v2519_v0 }
 0x187   : > { %2253 = vmatpush3.msra.mxu0 %v3061_v3  ;;  %2296 = vmatpush3.msra.mxu1 %v3099_v7 }
 0x188   : > { %2254 = vmatprep.subr.mxu0 %v2519_v0  ;;  %2297 = vmatprep.subr.mxu1 %v2519_v0 }
 0x189   : > { %2255 = vmatpush3.msra.mxu0 %v3076_v32  ;;  %2298 = vmatpush3.msra.mxu1 %v3113_v41 }
 0x18a   : > { %2256 = vmatprep.subr.mxu0 %v2519_v0  ;;  %2299 = vmatprep.subr.mxu1 %v2519_v0 }
 0x18b   : > { %2257 = vmatpush3.msra.mxu0 %v3088_v54  ;;  %2300 = vmatpush3.msra.mxu1 %v3123_v18 }
 0x18c   : > { %2258 = vmatprep.subr.mxu0 %v2519_v0  ;;  %2301 = vmatprep.subr.mxu1 %v2519_v0 }
 0x18d   : > { %2259 = vmatpush3.msra.mxu0 %v3103_v9  ;;  %2302 = vmatpush3.msra.mxu1 %v3138_v35 }
 0x18e   : > { %2260 = vmatprep.subr.mxu0 %v2519_v0  ;;  %2303 = vmatprep.subr.mxu1 %v2519_v0 }
 0x18f   : > { %2261 = vmatpush3.msra.mxu0 %v3111_v39  ;;  %2304 = vmatpush3.msra.mxu1 %v3151_v13 }
 0x190   : > { %2262 = vmatprep.subr.mxu0 %v2519_v0  ;;  %2305 = vmatprep.subr.mxu1 %v2519_v0 }
 0x191   : > { %2263 = vmatpush3.msra.mxu0 %v3121_v12  ;;  %2306 = vmatpush3.msra.mxu1 %v3159_v44 }
 0x192   : > { %2264 = vmatprep.subr.mxu0 %v2519_v0  ;;  %2308 = vmatmul.mubr.f32.vlgmr.msra.gmra.mxu1 %v1067_v61 }
 0x193   : > { %2345 = vmatprep.subr.mxu1 %v2519_v0  ;;  %2265 = vmatpush3.msra.mxu0 %v3136_v34 }
 0x194   : > { %2346 = vmatpush3.msra.mxu1 %v2997_v5  ;;  %2266 = vmatprep.subr.mxu0 %v2519_v0  ;;  %v3386_v5 = vand.u32 4294901760, %v3103_v9 }
 0x195   : > { %2347 = vmatprep.subr.mxu1 %v2519_v0  ;;  %2267 = vmatpush3.msra.mxu0 %v3148_v62 }
 0x196   : > { %2348 = vmatpush3.msra.mxu1 %v3002_v11  ;;  %2268 = vmatprep.subr.mxu0 %v2519_v0  ;;  %v3388_v11 = vand.u32 4294901760, %v3121_v12 }
 0x197   : > { %2349 = vmatprep.subr.mxu1 %v2519_v0  ;;  %2269 = vmatpush3.msra.mxu0 %v3163_v49 }
 0x198   : > { %2350 = vmatpush3.msra.mxu1 %v3010_v17  ;;  %2270 = vmatprep.subr.mxu0 %v2519_v0  ;;  %v3391_v17 = vand.u32 4294901760, %v3163_v49 }
 0x199   : > { %2351 = vmatprep.subr.mxu1 %v2519_v0  ;;  %2271 = vmatpush3.msra.mxu0 %v3171_v1 }
 0x19a   : > { %2272 = vmatprep.mubr.msk.f32.mxu0 %vm2520_vm0, %v2519_v0  ;;  %2352 = vmatpush3.msra.mxu1 %v3021_v23 }
 0x19b   : > { %2273 = vmatmul.mubr.f32.vlgmr.msra.gmra.mxu0 %v3195_v50  ;;  %2310 = vmatprep.subr.mxu0 %v2519_v0 }
 0x19c   : > { %2353 = vmatprep.subr.mxu1 %v2519_v0  ;;  %2311 = vmatpush3.msra.mxu0 %v1078_v15  ;;  %v3389_v15 = vand.u32 4294901760, %v3136_v34 }
 0x19d   : > { %2354 = vmatpush3.msra.mxu1 %v3033_v30  ;;  %2312 = vmatprep.subr.mxu0 %v2519_v0 }
 0x19e   : > { %2355 = vmatprep.subr.mxu1 %v2519_v0  ;;  %2313 = vmatpush3.msra.mxu0 %v1085_v21  ;;  %v3392_v21 = vand.u32 4294901760, %v3171_v1 }
 0x19f   : > { %2356 = vmatpush3.msra.mxu1 %v3040_v45  ;;  %2314 = vmatprep.subr.mxu0 %v2519_v0 }
 0x1a0   : > { %2357 = vmatprep.subr.mxu1 %v2519_v0  ;;  %2315 = vmatpush3.msra.mxu0 %v1092_v28 }
 0x1a1   : > { %2358 = vmatpush3.msra.mxu1 %v3053_v57  ;;  %2316 = vmatprep.subr.mxu0 %v2519_v0 }
 0x1a2   : > { %2359 = vmatprep.subr.mxu1 %v2519_v0  ;;  %2317 = vmatpush3.msra.mxu0 %v1099_v43 }
 0x1a3   : > { %2360 = vmatpush3.msra.mxu1 %v3063_v8  ;;  %2318 = vmatprep.subr.mxu0 %v2519_v0 }
 0x1a4   : > { %2361 = vmatprep.subr.mxu1 %v2519_v0  ;;  %2319 = vmatpush3.msra.mxu0 %v1106_v59 }
 0x1a5   : > { %2362 = vmatpush3.msra.mxu1 %v3078_v37  ;;  %2320 = vmatprep.subr.mxu0 %v2519_v0 }
 0x1a6   : > { %2363 = vmatprep.subr.mxu1 %v2519_v0  ;;  %2321 = vmatpush3.msra.mxu0 %v1113_v63 }
 0x1a7   : > { %2364 = vmatpush3.msra.mxu1 %v3091_v56  ;;  %2322 = vmatprep.subr.mxu0 %v2519_v0 }
 0x1a8   : > { %2365 = vmatprep.subr.mxu1 %v2519_v0  ;;  %2323 = vmatpush3.msra.mxu0 %v1120_v31  ;;  %v1753_v31 = vld [vmem:[%s3374_s4] ss:$0 sm:$0xff] }
 0x1a9   : > { %2366 = vmatpush3.msra.mxu1 %v3099_v7  ;;  %2324 = vmatprep.subr.mxu0 %v2519_v0 }
 0x1aa   : > { %2367 = vmatprep.subr.mxu1 %v2519_v0  ;;  %2325 = vmatpush3.msra.mxu0 %v1127_v52 }
 0x1ab   : > { %2368 = vmatpush3.msra.mxu1 %v3113_v41  ;;  %2326 = vmatprep.subr.mxu0 %v2519_v0 }
 0x1ac   : > { %2369 = vmatprep.subr.mxu1 %v2519_v0  ;;  %2327 = vmatpush3.msra.mxu0 %v1134_v2 }
 0x1ad   : > { %2370 = vmatpush3.msra.mxu1 %v3123_v18  ;;  %2328 = vmatprep.subr.mxu0 %v2519_v0 }
 0x1ae   : > { %2371 = vmatprep.subr.mxu1 %v2519_v0  ;;  %2329 = vmatpush3.msra.mxu0 %v3386_v5 }
 0x1af   : > { %2372 = vmatpush3.msra.mxu1 %v3138_v35  ;;  %2330 = vmatprep.subr.mxu0 %v2519_v0 }
 0x1b0   : > { %2373 = vmatprep.subr.mxu1 %v2519_v0  ;;  %2331 = vmatpush3.msra.mxu0 %v3387_v10 }
 0x1b1   : > { %2374 = vmatpush3.msra.mxu1 %v3151_v13  ;;  %2332 = vmatprep.subr.mxu0 %v2519_v0 }
 0x1b2   : > { %2375 = vmatprep.subr.mxu1 %v2519_v0  ;;  %2333 = vmatpush3.msra.mxu0 %v3388_v11 }
 0x1b3   : > { %2376 = vmatpush3.msra.mxu1 %v3159_v44  ;;  %2377 = vmatprep.mubr.msk.f32.mxu1 %vm2520_vm0, %v2519_v0 }
 0x1b4   : > { %2334 = vmatprep.subr.mxu0 %v2519_v0  ;;  %2378 = vmatmul.mubr.f32.vlgmr.msra.gmra.mxu1 %v3192_v6 }
 0x1b5   : > { %2335 = vmatpush3.msra.mxu0 %v3389_v15  ;;  %2342 = vmatprep.mubr.msk.f32.mxu0 %vm2520_vm0, %v2519_v0 }
 0x1b6   : > { %2336 = vmatprep.subr.mxu0 %v2519_v0 }
 0x1b7   : > { %2337 = vmatpush3.msra.mxu0 %v3390_v16 }
 0x1b8   : > { %2338 = vmatprep.subr.mxu0 %v2519_v0 }
 0x1b9   : > { %2339 = vmatpush3.msra.mxu0 %v3391_v17 }
 0x1ba   : > { %2340 = vmatprep.subr.mxu0 %v2519_v0 }
 0x1bb   : > { %2341 = vmatpush3.msra.mxu0 %v3392_v21 }
 0x1bc   : > { %2343 = vmatmul.mubr.f32.vlgmr.msra.gmra.mxu0 %v3192_v6 }
 0x232   : > { %v1222_v22 = vpop.f32.mrf.mxu1 }
 0x234   : > { %v2239_v23 = vpop.f32.mrf.mxu1 }
 0x23a   : > { %v1071_v28 = vpop.f32.mrf.mxu0 }
 0x23b   : > { %v1223_v57 = vadd.f32 %v1222_v22, %v1071_v28 }
 0x23c   : > { %v2204_v29 = vpop.f32.mrf.mxu0 }
 0x252   : > { %v1415_v30 = vpop.f32.mrf.mxu1 }
 0x254   : > { %v2309_v43 = vpop.f32.mrf.mxu1 }
 0x25b   : > { %v1326_v45 = vpop.f32.mrf.mxu0 }
 0x25c   : > { %v1327_v63 = vadd.f32 %v1326_v45, %v1223_v57 }
 0x25d   : > { %v2274_v46 = vpop.f32.mrf.mxu0 }
 0x25e   : > { %v1416_v3 = vadd.f32 %v1415_v30, %v1327_v63 }
 0x274   : > { %v1621_v55 = vpop.f32.mrf.mxu1 }
 0x276   : > { %v2379_v59 = vpop.f32.mrf.mxu1 }
 0x27c   : > { %v1534_v0 = vpop.f32.mrf.mxu0 }
 0x27d   : > { %v1535_v8 = vadd.f32 %v1534_v0, %v1416_v3 }
 0x27e   : > { %v2344_v32 = vpop.f32.mrf.mxu0 }
 0x27f   : > { %v1622_v37 = vadd.f32 %v1621_v55, %v1535_v8 }
 0x281   : > { %v1638_v52 = vadd.f32 %v1753_v31, %v1622_v37 }
 0x283   : > { %1639 = vst [vmem:[%s291_s27] sm:$0xff] %v1638_v52 }
 0x284 PF: > { %s17_s20 = sadd.s32 1, %s2513_s20   ;;  %s3393_s18 = smov %s2509_s19 }
 0x285   : > { %p14_p4 = scmp.ge.s32.totalorder %s17_s20, 4   ;;  %s3394_s19 = smov %s3396_s22 }
 0x287   :  { %16 = sbr.rel (!%p14_p4) target bundleno = 3 (0x3), region = 92 }
 0x28c   :  { %1659 = vsyncpa [#allocation4], 1 }
 0x28d   :  { %1661 = vsyncpa [#allocation4 + $0x1], 1 }
 0x28e   :  { %1662 = vsyncpa [#allocation6], 1 }

</bundles_post_ra>
